<compile_context>
chip_gen: v6e
topology: v6e:2x2x1
jax: 0.10.0
libtpu: 0.0.40
codegen_flags: <defaults>
</compile_context>

<pallas_src>
import functools

import jax
import jax.numpy as jnp
from jax.experimental import pallas as pl
from jax.experimental.pallas import tpu as pltpu


def _round_up(a: int, b: int) -> int:
    return ((a + b - 1) // b) * b


def _ffn_kernel(x_ref, w1_ref, b1_ref, w2_ref, b2_ref, o_ref, acc_ref):
    # x_ref : (tm, Dp)   compute dtype (e.g. bf16)
    # w1_ref: (Dp, th)   compute dtype      b1_ref: (1, th) f32
    # w2_ref: (th, Dp)   compute dtype      b2_ref: (1, Dp) f32
    # o_ref : (tm, Dp)   output dtype       acc_ref: (tm, Dp) f32 scratch
    h_idx = pl.program_id(1)

    @pl.when(h_idx == 0)
    def _init():
        acc_ref[...] = jnp.zeros_like(acc_ref)

    # First linear for this H-tile (MXU, f32 accumulation), bias + ReLU in f32.
    h = jnp.dot(x_ref[...], w1_ref[...], preferred_element_type=jnp.float32)
    h = jnp.maximum(h + b1_ref[...], 0.0)

    # Second linear: partial contribution of this H-tile, accumulated in f32.
    # (Deliberate: activations are cast to the weight/compute dtype for the MXU.)
    acc_ref[...] += jnp.dot(h.astype(w2_ref.dtype), w2_ref[...],
                            preferred_element_type=jnp.float32)

    @pl.when(h_idx == pl.num_programs(1) - 1)
    def _finalize():
        o_ref[...] = (acc_ref[...] + b2_ref[...]).astype(o_ref.dtype)


@functools.partial(jax.jit, static_argnames=("tm", "th", "compute_dtype"))
def feed_forward(x, w1, b1, w2, b2, *, tm=256, th=512,
                 compute_dtype=jnp.bfloat16):
    """x: (B, T, D) -> (B, T, D). y = relu(x @ W1 + b1) @ W2 + b2 (eval dropout)."""
    B, T, D = x.shape
    H = w1.shape[1]
    M = B * T
    out_dtype = x.dtype

    # ---- tile sizes / padded shapes (lane-dense, (8,128)-aligned) ----
    tm_e = max(128, _round_up(min(tm, M), 128))   # rows per tile (use tm=128 on v5e)
    th_e = max(128, _round_up(min(th, H), 128))   # hidden columns per tile
    Mp = _round_up(M, tm_e)
    Dp = _round_up(D, 128)
    Hp = _round_up(H, th_e)
    grid_m = Mp // tm_e
    grid_h = Hp // th_e

    # ---- cast (matmul operands to compute dtype, biases stay f32) + zero-pad ----
    x2d = x.reshape(M, D).astype(compute_dtype)
    if (Mp, Dp) != (M, D):
        x2d = jnp.pad(x2d, ((0, Mp - M), (0, Dp - D)))
    w1c = w1.astype(compute_dtype)
    if (Dp, Hp) != (D, H):
        w1c = jnp.pad(w1c, ((0, Dp - D), (0, Hp - H)))
    w2c = w2.astype(compute_dtype)
    if (Hp, Dp) != (H, D):
        w2c = jnp.pad(w2c, ((0, Hp - H), (0, Dp - D)))
    b1f = b1.astype(jnp.float32).reshape(1, H)
    if Hp != H:
        b1f = jnp.pad(b1f, ((0, 0), (0, Hp - H)))
    b2f = b2.astype(jnp.float32).reshape(1, D)
    if Dp != D:
        b2f = jnp.pad(b2f, ((0, 0), (0, Dp - D)))

    # ---- VMEM budget for the chosen tiles (double-buffered streams + scratch) ----
    cb = jnp.dtype(compute_dtype).itemsize
    ob = jnp.dtype(out_dtype).itemsize
    vmem_est = (
        2 * (tm_e * Dp * cb            # x tile
             + Dp * th_e * cb          # W1 tile
             + th_e * Dp * cb          # W2 tile
             + th_e * 4 + Dp * 4       # bias tiles (f32)
             + tm_e * Dp * ob)         # output tile
        + tm_e * Dp * 4                # f32 accumulator scratch
    )
    vmem_limit = int(min(max(2 * vmem_est, 32 * 1024 * 1024), 64 * 1024 * 1024))

    cost = pl.CostEstimate(
        flops=4 * Mp * Dp * Hp,                       # two GEMMs, 2 flops / MAC
        transcendentals=0,
        bytes_accessed=int(Mp * Dp * (cb + ob)
                           + grid_m * 2 * Dp * Hp * cb
                           + Hp * 4 + Dp * 4),
    )

    out_padded = pl.pallas_call(
        _ffn_kernel,
        out_shape=jax.ShapeDtypeStruct((Mp, Dp), out_dtype),
        grid_spec=pltpu.PrefetchScalarGridSpec(
            num_scalar_prefetch=0,
            grid=(grid_m, grid_h),                    # reduction axis (H) last
            in_specs=[
                pl.BlockSpec((tm_e, Dp), lambda i, h: (i, 0)),   # x row tile
                pl.BlockSpec((Dp, th_e), lambda i, h: (0, h)),   # W1 column tile
                pl.BlockSpec((1, th_e), lambda i, h: (0, h)),    # b1 tile
                pl.BlockSpec((th_e, Dp), lambda i, h: (h, 0)),   # W2 row tile
                pl.BlockSpec((1, Dp), lambda i, h: (0, 0)),      # b2 (constant)
            ],
            out_specs=pl.BlockSpec((tm_e, Dp), lambda i, h: (i, 0)),
            scratch_shapes=[pltpu.VMEM((tm_e, Dp), jnp.float32)],
        ),
        compiler_params=pltpu.CompilerParams(
            dimension_semantics=("parallel", "arbitrary"),
            vmem_limit_bytes=vmem_limit,
        ),
        cost_estimate=cost,
    )(x2d, w1c, b1f, w2c, b2f)

    return out_padded[:M, :D].reshape(B, T, D)


def init_params(key, d_embed):
    """Deterministic init mimicking nn.Linear (uniform +/- 1/sqrt(fan_in))."""
    h = 4 * d_embed
    k1, k2, k3, k4 = jax.random.split(key, 4)
    lim1 = 1.0 / jnp.sqrt(d_embed)
    lim2 = 1.0 / jnp.sqrt(h)
    # Stored as (in_features, out_features) for row-major matmul in the kernel.
    w1 = jax.random.uniform(k1, (d_embed, h), jnp.float32, -lim1, lim1)
    b1 = jax.random.uniform(k2, (h,), jnp.float32, -lim1, lim1)
    w2 = jax.random.uniform(k3, (h, d_embed), jnp.float32, -lim2, lim2)
    b2 = jax.random.uniform(k4, (d_embed,), jnp.float32, -lim2, lim2)
    return w1, b1, w2, b2


if __name__ == "__main__":
    key = jax.random.PRNGKey(0)
    B, T, D = 2, 8, 32           # small shapes: batch=2, seq=8, d_embed=32
    k_x, k_p = jax.random.split(key)
    x = jax.random.normal(k_x, (B, T, D), jnp.float32)
    w1, b1, w2, b2 = init_params(k_p, D)

    # Reference in plain JAX (eval-mode dropout == identity), f32 throughout.
    ref = jnp.maximum(x.reshape(-1, D) @ w1 + b1, 0.0) @ w2 + b2
    ref = ref.reshape(B, T, D)

    # f32 compute path: must match the reference tightly.
    out_f32 = feed_forward(x, w1, b1, w2, b2, compute_dtype=jnp.float32)
    out_f32 = jax.block_until_ready(out_f32)
    assert out_f32.shape == (B, T, D)
    assert jnp.allclose(out_f32, ref, atol=1e-5, rtol=1e-5)

    # Default bf16-matmul / f32-accumulation path: loose tolerance vs f32 ref.
    out_bf16 = feed_forward(x, w1, b1, w2, b2)
    out_bf16 = jax.block_until_ready(out_bf16)
    assert out_bf16.shape == (B, T, D)
    assert jnp.allclose(out_bf16, ref, atol=5e-2, rtol=5e-2)

    print("KERNEL_OK")
</pallas_src>

<mosaic_0001>
module attributes {stable_mosaic.version = 11 : i64} {
  func.func @_ffn_kernel(%arg0: i32, %arg1: i32, %arg2: memref<128x128xf32, #tpu.memory_space<vmem>>, %arg3: memref<128x128xf32, #tpu.memory_space<vmem>>, %arg4: memref<1x128xf32, #tpu.memory_space<vmem>>, %arg5: memref<128x128xf32, #tpu.memory_space<vmem>>, %arg6: memref<1x128xf32, #tpu.memory_space<vmem>>, %arg7: memref<128x128xf32, #tpu.memory_space<vmem>>, %arg8: memref<128x128xf32, #tpu.memory_space<vmem>>) attributes {dimension_semantics = [#tpu.dimension_semantics<parallel>, #tpu.dimension_semantics<arbitrary>], iteration_bounds = array<i64: 1, 1>, scalar_prefetch = 0 : i64, scratch_operands = 1 : i64, tpu.core_type = #tpu.core_type<tc>, window_params = [{transform_indices = @transform_0, window_bounds = array<i64: 128, 128>}, {transform_indices = @transform_1, window_bounds = array<i64: 128, 128>}, {transform_indices = @transform_2, window_bounds = array<i64: 1, 128>}, {transform_indices = @transform_3, window_bounds = array<i64: 128, 128>}, {pipeline_mode = #tpu.pipeline_mode<synchronous>, transform_indices = @transform_4, window_bounds = array<i64: 1, 128>}, {transform_indices = @transform_5, window_bounds = array<i64: 128, 128>}]} {
    %c0_i32 = arith.constant 0 : i32
    %0 = arith.cmpi eq, %arg1, %c0_i32 : i32
    %1 = arith.extui %0 : i1 to i32
    %c0_i32_0 = arith.constant 0 : i32
    %2 = arith.cmpi ne, %1, %c0_i32_0 : i32
    scf.if %2 {
      %cst_16 = arith.constant 0.000000e+00 : f32
      %19 = vector.broadcast %cst_16 : f32 to vector<128x128xf32>
      %c0_17 = arith.constant 0 : index
      %c0_18 = arith.constant 0 : index
      %20 = vector.load %arg8[%c0_17, %c0_18] : memref<128x128xf32, #tpu.memory_space<vmem>>, vector<128x128xf32>
      tpu.vector_store %arg8[%c0_17, %c0_18], %19 {strides = array<i32>} : memref<128x128xf32, #tpu.memory_space<vmem>>, vector<128x128xf32>,
    } else {
    }
    %c0 = arith.constant 0 : index
    %c0_1 = arith.constant 0 : index
    %3 = vector.load %arg2[%c0, %c0_1] : memref<128x128xf32, #tpu.memory_space<vmem>>, vector<128x128xf32>
    %c0_2 = arith.constant 0 : index
    %c0_3 = arith.constant 0 : index
    %4 = vector.load %arg3[%c0_2, %c0_3] : memref<128x128xf32, #tpu.memory_space<vmem>>, vector<128x128xf32>
    %cst = arith.constant dense<0.000000e+00> : vector<128x128xf32>
    %5 = tpu.matmul %3, %4, %cst {dimension_numbers = #tpu.dot_dimension_numbers<[1], [0], [0], [1], [0, 0, 1, 1], [], []>} : vector<128x128xf32>, vector<128x128xf32>, vector<128x128xf32> -> vector<128x128xf32>
    %c0_4 = arith.constant 0 : index
    %c0_5 = arith.constant 0 : index
    %6 = vector.load %arg4[%c0_4, %c0_5] : memref<1x128xf32, #tpu.memory_space<vmem>>, vector<1x128xf32>
    %7 = vector.broadcast %6 : vector<1x128xf32> to vector<128x128xf32>
    %8 = arith.addf %5, %7 : vector<128x128xf32>
    %cst_6 = arith.constant 0.000000e+00 : f32
    %9 = vector.broadcast %cst_6 : f32 to vector<128x128xf32>
    %10 = arith.maximumf %8, %9 : vector<128x128xf32>
    %c0_7 = arith.constant 0 : index
    %c0_8 = arith.constant 0 : index
    %11 = vector.load %arg8[%c0_7, %c0_8] : memref<128x128xf32, #tpu.memory_space<vmem>>, vector<128x128xf32>
    %c0_9 = arith.constant 0 : index
    %c0_10 = arith.constant 0 : index
    %12 = vector.load %arg5[%c0_9, %c0_10] : memref<128x128xf32, #tpu.memory_space<vmem>>, vector<128x128xf32>
    %cst_11 = arith.constant dense<0.000000e+00> : vector<128x128xf32>
    %13 = tpu.matmul %10, %12, %cst_11 {dimension_numbers = #tpu.dot_dimension_numbers<[1], [0], [0], [1], [0, 0, 1, 1], [], []>} : vector<128x128xf32>, vector<128x128xf32>, vector<128x128xf32> -> vector<128x128xf32>
    %14 = arith.addf %11, %13 : vector<128x128xf32>
    %c0_12 = arith.constant 0 : index
    %c0_13 = arith.constant 0 : index
    %15 = vector.load %arg8[%c0_12, %c0_13] : memref<128x128xf32, #tpu.memory_space<vmem>>, vector<128x128xf32>
    tpu.vector_store %arg8[%c0_12, %c0_13], %14 {strides = array<i32>} : memref<128x128xf32, #tpu.memory_space<vmem>>, vector<128x128xf32>,
    %c0_i32_14 = arith.constant 0 : i32
    %16 = arith.cmpi eq, %arg1, %c0_i32_14 : i32
    %17 = arith.extui %16 : i1 to i32
    %c0_i32_15 = arith.constant 0 : i32
    %18 = arith.cmpi ne, %17, %c0_i32_15 : i32
    scf.if %18 {
      %c0_16 = arith.constant 0 : index
      %c0_17 = arith.constant 0 : index
      %19 = vector.load %arg8[%c0_16, %c0_17] : memref<128x128xf32, #tpu.memory_space<vmem>>, vector<128x128xf32>
      %c0_18 = arith.constant 0 : index
      %c0_19 = arith.constant 0 : index
      %20 = vector.load %arg6[%c0_18, %c0_19] : memref<1x128xf32, #tpu.memory_space<vmem>>, vector<1x128xf32>
      %21 = vector.broadcast %20 : vector<1x128xf32> to vector<128x128xf32>
      %22 = arith.addf %19, %21 : vector<128x128xf32>
      %c0_20 = arith.constant 0 : index
      %c0_21 = arith.constant 0 : index
      %23 = vector.load %arg7[%c0_20, %c0_21] : memref<128x128xf32, #tpu.memory_space<vmem>>, vector<128x128xf32>
      tpu.vector_store %arg7[%c0_20, %c0_21], %22 {strides = array<i32>} : memref<128x128xf32, #tpu.memory_space<vmem>>, vector<128x128xf32>,
    } else {
    }
    return
  }
  func.func @transform_0(%arg0: i32, %arg1: i32) -> (i32, i32) {
    %c0_i32 = arith.constant 0 : i32
    %c0_i32_0 = arith.constant 0 : i32
    return %arg0, %c0_i32 : i32, i32
  }
  func.func @transform_1(%arg0: i32, %arg1: i32) -> (i32, i32) {
    %c0_i32 = arith.constant 0 : i32
    %c0_i32_0 = arith.constant 0 : i32
    return %c0_i32, %arg1 : i32, i32
  }
  func.func @transform_2(%arg0: i32, %arg1: i32) -> (i32, i32) {
    %c0_i32 = arith.constant 0 : i32
    %c0_i32_0 = arith.constant 0 : i32
    return %c0_i32, %arg1 : i32, i32
  }
  func.func @transform_3(%arg0: i32, %arg1: i32) -> (i32, i32) {
    %c0_i32 = arith.constant 0 : i32
    %c0_i32_0 = arith.constant 0 : i32
    return %arg1, %c0_i32 : i32, i32
  }
  func.func @transform_4(%arg0: i32, %arg1: i32) -> (i32, i32) {
    %c0_i32 = arith.constant 0 : i32
    %c0_i32_0 = arith.constant 0 : i32
    %c0_i32_1 = arith.constant 0 : i32
    return %c0_i32, %c0_i32_0 : i32, i32
  }
  func.func @transform_5(%arg0: i32, %arg1: i32) -> (i32, i32) {
    %c0_i32 = arith.constant 0 : i32
    %c0_i32_0 = arith.constant 0 : i32
    return %arg0, %c0_i32 : i32, i32
  }
}

</mosaic_0001>

<bundles_post_ra>
// kernel: feed_forward.1
= control target key start
LH: loop header
LB: loop body
LE: loop exit
PB: predicated region body
PF: predicated region fallthrough
CT: control target
= control target key end

     0   :  { %s917_s1 = inlined_call_operand.vmem [shape: f32[128,128], index: 1, kind: input, shape index: {}]   ;;  %s918_s0 = inlined_call_operand.vmem [shape: f32[128,128], index: 0, kind: input, shape index: {}]   ;;  %s919_s3 = inlined_call_operand.vmem [shape: f32[128,128], index: 3, kind: input, shape index: {}]   ;;  %s920_s2 = inlined_call_operand.vmem [shape: f32[1,128], index: 2, kind: input, shape index: {}]   ;;  %s921_s4 = inlined_call_operand.vmem [shape: f32[1,128], index: 4, kind: input, shape index: {}]   ;;  %s922_s5 = inlined_call_operand.vmem [shape: f32[128,128], index: 5, kind: output, shape index: {}]  }
   0x1   :  { %v71_v0 = vld [vmem:[%s917_s1 + $0x78] sm:$0xff]  ;;  %v70_v1 = vld [vmem:[%s917_s1 + $0x70] sm:$0xff]  ;;  %v69_v2 = vld [vmem:[%s917_s1 + $0x68] sm:$0xff] }
   0x2   :  { %577 = vmatprep.subr.mxu0 %v71_v0  ;;  %v68_v3 = vld [vmem:[%s917_s1 + $0x60] sm:$0xff]  ;;  %v67_v5 = vld [vmem:[%s917_s1 + $0x58] sm:$0xff]  ;;  %v66_v6 = vld [vmem:[%s917_s1 + $0x50] sm:$0xff] }
   0x3   :  { %578 = vmatpush3.msra.mxu0 %v71_v0  ;;  %v40_v4 = vld [vmem:[%s918_s0] sm:$0xff]  ;;  %v65_v7 = vld [vmem:[%s917_s1 + $0x48] sm:$0xff]  ;;  %v271_v8 = vld [vmem:[%s919_s3 + $0x78] sm:$0xff] }
   0x4   :  { %579 = vmatprep.subr.mxu0 %v70_v1  ;;  %609 = vmatprep.mubr.f32.mxu0 %v40_v4  ;;  %v270_v9 = vld [vmem:[%s919_s3 + $0x70] sm:$0xff]  ;;  %v64_v10 = vld [vmem:[%s917_s1 + $0x40] sm:$0xff]  ;;  %v269_v11 = vld [vmem:[%s919_s3 + $0x68] sm:$0xff] }
   0x5   :  { %580 = vmatpush3.msra.mxu0 %v70_v1  ;;  %633 = vmatprep.subr.mxu1 %v271_v8  ;;  %v63_v12 = vld [vmem:[%s917_s1 + $0x38] sm:$0xff]  ;;  %v268_v13 = vld [vmem:[%s919_s3 + $0x60] sm:$0xff]  ;;  %v62_v14 = vld [vmem:[%s917_s1 + $0x30] sm:$0xff] }
   0x6   :  { %581 = vmatprep.subr.mxu0 %v69_v2  ;;  %634 = vmatpush3.msra.mxu1 %v271_v8  ;;  %v267_v15 = vld [vmem:[%s919_s3 + $0x58] sm:$0xff]  ;;  %v61_v16 = vld [vmem:[%s917_s1 + $0x28] sm:$0xff]  ;;  %v266_v17 = vld [vmem:[%s919_s3 + $0x50] sm:$0xff] }
   0x7   :  { %582 = vmatpush3.msra.mxu0 %v69_v2  ;;  %635 = vmatprep.subr.mxu1 %v270_v9  ;;  %v60_v18 = vld [vmem:[%s917_s1 + $0x20] sm:$0xff]  ;;  %v265_v19 = vld [vmem:[%s919_s3 + $0x48] sm:$0xff]  ;;  %v59_v20 = vld [vmem:[%s917_s1 + $0x18] sm:$0xff] }
   0x8   :  { %583 = vmatprep.subr.mxu0 %v68_v3  ;;  %636 = vmatpush3.msra.mxu1 %v270_v9  ;;  %v264_v21 = vld [vmem:[%s919_s3 + $0x40] sm:$0xff]  ;;  %v58_v22 = vld [vmem:[%s917_s1 + $0x10] sm:$0xff]  ;;  %v263_v23 = vld [vmem:[%s919_s3 + $0x38] sm:$0xff] }
   0x9   :  { %584 = vmatpush3.msra.mxu0 %v68_v3  ;;  %637 = vmatprep.subr.mxu1 %v269_v11  ;;  %v57_v24 = vld [vmem:[%s917_s1 + $0x8] sm:$0xff]  ;;  %v262_v25 = vld [vmem:[%s919_s3 + $0x30] sm:$0xff]  ;;  %v56_v26 = vld [vmem:[%s917_s1] sm:$0xff] }
   0xa   :  { %585 = vmatprep.subr.mxu0 %v67_v5  ;;  %638 = vmatpush3.msra.mxu1 %v269_v11  ;;  %v261_v27 = vld [vmem:[%s919_s3 + $0x28] sm:$0xff]  ;;  %v260_v29 = vld [vmem:[%s919_s3 + $0x20] sm:$0xff]  ;;  %v42_v30 = vld [vmem:[%s918_s0 + $0x10] sm:$0xff] }
   0xb   :  { %586 = vmatpush3.msra.mxu0 %v67_v5  ;;  %639 = vmatprep.subr.mxu1 %v268_v13  ;;  %v41_v28 = vld [vmem:[%s918_s0 + $0x8] sm:$0xff]  ;;  %v43_v31 = vld [vmem:[%s918_s0 + $0x18] sm:$0xff]  ;;  %v44_v32 = vld [vmem:[%s918_s0 + $0x20] sm:$0xff] }
   0xc   :  { %587 = vmatprep.subr.mxu0 %v66_v6  ;;  %640 = vmatpush3.msra.mxu1 %v268_v13  ;;  %v45_v33 = vld [vmem:[%s918_s0 + $0x28] sm:$0xff]  ;;  %v46_v34 = vld [vmem:[%s918_s0 + $0x30] sm:$0xff]  ;;  %v47_v35 = vld [vmem:[%s918_s0 + $0x38] sm:$0xff] }
   0xd   :  { %588 = vmatpush3.msra.mxu0 %v66_v6  ;;  %641 = vmatprep.subr.mxu1 %v267_v15  ;;  %v48_v36 = vld [vmem:[%s918_s0 + $0x40] sm:$0xff]  ;;  %v49_v37 = vld [vmem:[%s918_s0 + $0x48] sm:$0xff]  ;;  %v50_v38 = vld [vmem:[%s918_s0 + $0x50] sm:$0xff] }
   0xe   :  { %589 = vmatprep.subr.mxu0 %v65_v7  ;;  %642 = vmatpush3.msra.mxu1 %v267_v15  ;;  %v51_v39 = vld [vmem:[%s918_s0 + $0x58] sm:$0xff]  ;;  %v52_v40 = vld [vmem:[%s918_s0 + $0x60] sm:$0xff]  ;;  %v53_v41 = vld [vmem:[%s918_s0 + $0x68] sm:$0xff] }
   0xf   :  { %590 = vmatpush3.msra.mxu0 %v65_v7  ;;  %643 = vmatprep.subr.mxu1 %v266_v17  ;;  %v54_v42 = vld [vmem:[%s918_s0 + $0x70] sm:$0xff]  ;;  %v55_v43 = vld [vmem:[%s918_s0 + $0x78] sm:$0xff]  ;;  %v257_v46 = vld [vmem:[%s919_s3 + $0x8] sm:$0xff] }
  0x10   :  { %591 = vmatprep.subr.mxu0 %v64_v10  ;;  %644 = vmatpush3.msra.mxu1 %v266_v17  ;;  %v259_v44 = vld [vmem:[%s919_s3 + $0x18] sm:$0xff]  ;;  %v258_v45 = vld [vmem:[%s919_s3 + $0x10] sm:$0xff]  ;;  %v256_v47 = vld [vmem:[%s919_s3] sm:$0xff] }
  0x11   :  { %592 = vmatpush3.msra.mxu0 %v64_v10  ;;  %645 = vmatprep.subr.mxu1 %v265_v19  ;;  %v511_v48 = vld [vmem:[%s920_s2] ss:$0 sm:$0xff] }
  0x12   :  { %593 = vmatprep.subr.mxu0 %v63_v12  ;;  %646 = vmatpush3.msra.mxu1 %v265_v19 }
  0x13   :  { %594 = vmatpush3.msra.mxu0 %v63_v12  ;;  %647 = vmatprep.subr.mxu1 %v264_v21 }
  0x14   :  { %595 = vmatprep.subr.mxu0 %v62_v14  ;;  %648 = vmatpush3.msra.mxu1 %v264_v21 }
  0x15   :  { %596 = vmatpush3.msra.mxu0 %v62_v14  ;;  %649 = vmatprep.subr.mxu1 %v263_v23 }
  0x16   :  { %597 = vmatprep.subr.mxu0 %v61_v16  ;;  %650 = vmatpush3.msra.mxu1 %v263_v23 }
  0x17   :  { %598 = vmatpush3.msra.mxu0 %v61_v16  ;;  %651 = vmatprep.subr.mxu1 %v262_v25 }
  0x18   :  { %599 = vmatprep.subr.mxu0 %v60_v18  ;;  %652 = vmatpush3.msra.mxu1 %v262_v25 }
  0x19   :  { %600 = vmatpush3.msra.mxu0 %v60_v18  ;;  %653 = vmatprep.subr.mxu1 %v261_v27 }
  0x1a   :  { %601 = vmatprep.subr.mxu0 %v59_v20  ;;  %654 = vmatpush3.msra.mxu1 %v261_v27 }
  0x1b   :  { %602 = vmatpush3.msra.mxu0 %v59_v20  ;;  %655 = vmatprep.subr.mxu1 %v260_v29 }
  0x1c   :  { %603 = vmatprep.subr.mxu0 %v58_v22  ;;  %656 = vmatpush3.msra.mxu1 %v260_v29 }
  0x1d   :  { %604 = vmatpush3.msra.mxu0 %v58_v22  ;;  %657 = vmatprep.subr.mxu1 %v259_v44 }
  0x1e   :  { %605 = vmatprep.subr.mxu0 %v57_v24  ;;  %658 = vmatpush3.msra.mxu1 %v259_v44 }
  0x1f   :  { %606 = vmatpush3.msra.mxu0 %v57_v24  ;;  %659 = vmatprep.subr.mxu1 %v258_v45 }
  0x20   :  { %607 = vmatprep.subr.mxu0 %v56_v26  ;;  %660 = vmatpush3.msra.mxu1 %v258_v45 }
  0x21   :  { %608 = vmatpush3.msra.mxu0 %v56_v26  ;;  %661 = vmatprep.subr.mxu1 %v257_v46 }
  0x22   :  { %610 = vmatmul.mubr.f32.vlgmr.msra.gmra.mxu0 %v41_v28  ;;  %662 = vmatpush3.msra.mxu1 %v257_v46 }
  0x23   :  { %612 = vmatprep.mubr.f32.mxu0 %v42_v30  ;;  %663 = vmatprep.subr.mxu1 %v256_v47 }
  0x24   :  { %664 = vmatpush3.msra.mxu1 %v256_v47 }
  0x26   :  { %613 = vmatmul.mubr.f32.gmra.mxu0 %v43_v31 }
  0x27   :  { %615 = vmatprep.mubr.f32.mxu0 %v44_v32 }
  0x2a   :  { %616 = vmatmul.mubr.f32.gmra.mxu0 %v45_v33  ;;  %v512_v33 = vld [vmem:[%s921_s4] ss:$0 sm:$0xff] }
  0x2b   :  { %618 = vmatprep.mubr.f32.mxu0 %v46_v34 }
  0x2e   :  { %619 = vmatmul.mubr.f32.gmra.mxu0 %v47_v35 }
  0x2f   :  { %621 = vmatprep.mubr.f32.mxu0 %v48_v36 }
  0x32   :  { %622 = vmatmul.mubr.f32.gmra.mxu0 %v49_v37 }
  0x33   :  { %624 = vmatprep.mubr.f32.mxu0 %v50_v38 }
  0x36   :  { %625 = vmatmul.mubr.f32.gmra.mxu0 %v51_v39 }
  0x37   :  { %627 = vmatprep.mubr.f32.mxu0 %v52_v40 }
  0x3a   :  { %628 = vmatmul.mubr.f32.gmra.mxu0 %v53_v41 }
  0x3b   :  { %630 = vmatprep.mubr.f32.mxu0 %v54_v42 }
  0x3e   :  { %631 = vmatmul.mubr.f32.gmra.mxu0 %v55_v43 }
  0xe2   :  { %v611_v49 = vpop.f32.mrf.mxu0 }
  0xe3   :  { %v151_v50 = vadd.f32 %v611_v49, %v511_v48 }
  0xe4   :  { %v145_v51 = vpop.f32.mrf.mxu0 }
  0xe5   :  { %v146_v52 = vadd.f32 %v511_v48, %v145_v51  ;;  %v225_v55 = vmax.f32 %v151_v50, 0.0 }
  0xe6   :  { %v614_v53 = vpop.f32.mrf.mxu0 }
  0xe7   :  { %v224_v54 = vmax.f32 %v146_v52, 0.0  ;;  %v161_v56 = vadd.f32 %v614_v53, %v511_v48 }
  0xe8   :  { %v155_v57 = vpop.f32.mrf.mxu0 }
  0xe9   :  { %v156_v58 = vadd.f32 %v511_v48, %v155_v57  ;;  %665 = vmatprep.mubr.f32.mxu1 %v224_v54  ;;  %v227_v61 = vmax.f32 %v161_v56, 0.0 }
  0xea   :  { %v617_v59 = vpop.f32.mrf.mxu0  ;;  %666 = vmatmul.mubr.f32.vlgmr.msra.gmra.mxu1 %v225_v55 }
  0xeb   :  { %v226_v60 = vmax.f32 %v156_v58, 0.0  ;;  %v171_v62 = vadd.f32 %v617_v59, %v511_v48 }
  0xec   :  { %v165_v63 = vpop.f32.mrf.mxu0 }
  0xed   :  { %v166_v0 = vadd.f32 %v511_v48, %v165_v63  ;;  %668 = vmatprep.mubr.f32.mxu1 %v226_v60  ;;  %v229_v3 = vmax.f32 %v171_v62, 0.0 }
  0xee   :  { %v620_v1 = vpop.f32.mrf.mxu0  ;;  %669 = vmatmul.mubr.f32.gmra.mxu1 %v227_v61 }
  0xef   :  { %v228_v2 = vmax.f32 %v166_v0, 0.0  ;;  %v181_v4 = vadd.f32 %v620_v1, %v511_v48 }
  0xf0   :  { %v175_v5 = vpop.f32.mrf.mxu0 }
  0xf1   :  { %v176_v6 = vadd.f32 %v511_v48, %v175_v5  ;;  %671 = vmatprep.mubr.f32.mxu1 %v228_v2  ;;  %v231_v9 = vmax.f32 %v181_v4, 0.0 }
  0xf2   :  { %v623_v7 = vpop.f32.mrf.mxu0  ;;  %672 = vmatmul.mubr.f32.gmra.mxu1 %v229_v3 }
  0xf3   :  { %v230_v8 = vmax.f32 %v176_v6, 0.0  ;;  %v191_v10 = vadd.f32 %v623_v7, %v511_v48 }
  0xf4   :  { %v185_v11 = vpop.f32.mrf.mxu0 }
  0xf5   :  { %v186_v12 = vadd.f32 %v511_v48, %v185_v11  ;;  %674 = vmatprep.mubr.f32.mxu1 %v230_v8  ;;  %v233_v15 = vmax.f32 %v191_v10, 0.0 }
  0xf6   :  { %v626_v13 = vpop.f32.mrf.mxu0  ;;  %675 = vmatmul.mubr.f32.gmra.mxu1 %v231_v9 }
  0xf7   :  { %v232_v14 = vmax.f32 %v186_v12, 0.0  ;;  %v201_v16 = vadd.f32 %v626_v13, %v511_v48 }
  0xf8   :  { %v195_v17 = vpop.f32.mrf.mxu0 }
  0xf9   :  { %v196_v18 = vadd.f32 %v511_v48, %v195_v17  ;;  %677 = vmatprep.mubr.f32.mxu1 %v232_v14  ;;  %v235_v21 = vmax.f32 %v201_v16, 0.0 }
  0xfa   :  { %v629_v19 = vpop.f32.mrf.mxu0  ;;  %678 = vmatmul.mubr.f32.gmra.mxu1 %v233_v15 }
  0xfb   :  { %v234_v20 = vmax.f32 %v196_v18, 0.0  ;;  %v211_v22 = vadd.f32 %v629_v19, %v511_v48 }
  0xfc   :  { %v205_v23 = vpop.f32.mrf.mxu0 }
  0xfd   :  { %v206_v24 = vadd.f32 %v511_v48, %v205_v23  ;;  %680 = vmatprep.mubr.f32.mxu1 %v234_v20  ;;  %v237_v27 = vmax.f32 %v211_v22, 0.0 }
  0xfe   :  { %v632_v25 = vpop.f32.mrf.mxu0  ;;  %681 = vmatmul.mubr.f32.gmra.mxu1 %v235_v21 }
  0xff   :  { %v236_v26 = vmax.f32 %v206_v24, 0.0  ;;  %v221_v28 = vadd.f32 %v632_v25, %v511_v48 }
 0x100   :  { %v215_v29 = vpop.f32.mrf.mxu0 }
 0x101   :  { %v216_v30 = vadd.f32 %v511_v48, %v215_v29  ;;  %683 = vmatprep.mubr.f32.mxu1 %v236_v26  ;;  %v239_v32 = vmax.f32 %v221_v28, 0.0 }
 0x102   :  { %684 = vmatmul.mubr.f32.gmra.mxu1 %v237_v27 }
 0x103   :  { %v238_v31 = vmax.f32 %v216_v30, 0.0 }
 0x105   :  { %686 = vmatprep.mubr.f32.mxu1 %v238_v31 }
 0x106   :  { %687 = vmatmul.mubr.f32.gmra.mxu1 %v239_v32 }
 0x1aa   :  { %v667_v34 = vpop.f32.mrf.mxu1 }
 0x1ab   :  { %v476_v35 = vadd.f32 %v667_v34, %v512_v33 }
 0x1ac   :  { %v338_v36 = vpop.f32.mrf.mxu1 }
 0x1ad   :  { %492 = vst [vmem:[%s922_s5 + $0x8] sm:$0xff] %v476_v35  ;;  %v475_v37 = vadd.f32 %v512_v33, %v338_v36 }
 0x1ae   :  { %v670_v38 = vpop.f32.mrf.mxu1 }
 0x1af   :  { %491 = vst [vmem:[%s922_s5] sm:$0xff] %v475_v37  ;;  %v478_v39 = vadd.f32 %v670_v38, %v512_v33 }
 0x1b0   :  { %v348_v40 = vpop.f32.mrf.mxu1 }
 0x1b1   :  { %494 = vst [vmem:[%s922_s5 + $0x18] sm:$0xff] %v478_v39  ;;  %v477_v41 = vadd.f32 %v512_v33, %v348_v40 }
 0x1b2   :  { %v673_v42 = vpop.f32.mrf.mxu1 }
 0x1b3   :  { %493 = vst [vmem:[%s922_s5 + $0x10] sm:$0xff] %v477_v41  ;;  %v480_v43 = vadd.f32 %v673_v42, %v512_v33 }
 0x1b4   :  { %v358_v44 = vpop.f32.mrf.mxu1 }
 0x1b5   :  { %496 = vst [vmem:[%s922_s5 + $0x28] sm:$0xff] %v480_v43  ;;  %v479_v45 = vadd.f32 %v512_v33, %v358_v44 }
 0x1b6   :  { %v676_v46 = vpop.f32.mrf.mxu1 }
 0x1b7   :  { %495 = vst [vmem:[%s922_s5 + $0x20] sm:$0xff] %v479_v45  ;;  %v482_v47 = vadd.f32 %v676_v46, %v512_v33 }
 0x1b8   :  { %v368_v48 = vpop.f32.mrf.mxu1 }
 0x1b9   :  { %498 = vst [vmem:[%s922_s5 + $0x38] sm:$0xff] %v482_v47  ;;  %v481_v49 = vadd.f32 %v512_v33, %v368_v48 }
 0x1ba   :  { %v679_v50 = vpop.f32.mrf.mxu1 }
 0x1bb   :  { %497 = vst [vmem:[%s922_s5 + $0x30] sm:$0xff] %v481_v49  ;;  %v484_v51 = vadd.f32 %v679_v50, %v512_v33 }
 0x1bc   :  { %v378_v52 = vpop.f32.mrf.mxu1 }
 0x1bd   :  { %500 = vst [vmem:[%s922_s5 + $0x48] sm:$0xff] %v484_v51  ;;  %v483_v53 = vadd.f32 %v512_v33, %v378_v52 }
 0x1be   :  { %v682_v54 = vpop.f32.mrf.mxu1 }
 0x1bf   :  { %499 = vst [vmem:[%s922_s5 + $0x40] sm:$0xff] %v483_v53  ;;  %v486_v55 = vadd.f32 %v682_v54, %v512_v33 }
 0x1c0   :  { %v388_v56 = vpop.f32.mrf.mxu1 }
 0x1c1   :  { %502 = vst [vmem:[%s922_s5 + $0x58] sm:$0xff] %v486_v55  ;;  %v485_v57 = vadd.f32 %v512_v33, %v388_v56 }
 0x1c2   :  { %v685_v58 = vpop.f32.mrf.mxu1 }
 0x1c3   :  { %501 = vst [vmem:[%s922_s5 + $0x50] sm:$0xff] %v485_v57  ;;  %v488_v59 = vadd.f32 %v685_v58, %v512_v33 }
 0x1c4   :  { %v398_v60 = vpop.f32.mrf.mxu1 }
 0x1c5   :  { %504 = vst [vmem:[%s922_s5 + $0x68] sm:$0xff] %v488_v59  ;;  %v487_v61 = vadd.f32 %v512_v33, %v398_v60 }
 0x1c6   :  { %v688_v62 = vpop.f32.mrf.mxu1 }
 0x1c7   :  { %503 = vst [vmem:[%s922_s5 + $0x60] sm:$0xff] %v487_v61  ;;  %v490_v63 = vadd.f32 %v688_v62, %v512_v33 }
 0x1c8   :  { %v408_v0 = vpop.f32.mrf.mxu1 }
 0x1c9   :  { %506 = vst [vmem:[%s922_s5 + $0x78] sm:$0xff] %v490_v63  ;;  %v489_v1 = vadd.f32 %v512_v33, %v408_v0 }
 0x1cb   :  { %505 = vst [vmem:[%s922_s5 + $0x70] sm:$0xff] %v489_v1 }

</bundles_post_ra>
